<compile_context>
chip_gen: v7x
topology: tpu7x:2x2x1
jax: 0.10.0
libtpu: 0.0.40
codegen_flags: <defaults>
</compile_context>

<pallas_src>
import jax
import jax.numpy as jnp
from jax.experimental import pallas as pl
from jax.experimental.pallas import tpu as pltpu


def _linear_kernel(x_ref, w_ref, b_ref, o_ref):
    # x_ref / o_ref: (tm, lanes) f32 VMEM tiles; w_ref / b_ref: (1, 1) SMEM scalars.
    w = w_ref[0, 0]
    b = b_ref[0, 0]
    # 2 VALU ops per vreg (f32 mul + add); the HBM DMA stream is the limiter,
    # so no further compute-side tricks are needed or useful.
    o_ref[...] = x_ref[...] * w + b


def linear_forward(x, weight, bias, *, lanes=1024, tile_rows=512):
    """x: (N, 1) f32, weight: (1, 1) f32, bias: (1,) f32 -> (N, 1) f32."""
    n, k = x.shape
    assert k == 1 and weight.shape == (1, 1) and bias.shape == (1,)

    w = weight[0, 0]
    b = bias[0]

    # Small-N bypass: for fewer than a few tiles of data the fixed pallas_call
    # cost (grid setup, DMA descriptors, ~0.35 us/step, launch) dominates; a
    # single fused XLA elementwise op is strictly faster.
    if n < 8 * lanes:
        return x * w + b

    # Largest lanes-multiple prefix -> lane-dense slab.  When N is already a
    # multiple of `lanes` this is a pure (copy-free) reshape; otherwise only
    # the prefix is taken and the tiny tail is handled below with jnp.
    n_main = (n // lanes) * lanes
    rows = n_main // lanes
    if n_main == n:
        slab = x.reshape(rows, lanes)
    else:
        slab = x.reshape(-1)[:n_main].reshape(rows, lanes)

    # Tile-row sizing:
    #   * multiple of 8 (sublane tiling constraint),
    #   * capped at tile_rows (512 rows x 1024 lanes x 4 B = 2 MiB per buffer),
    #   * clamped so large inputs get >= 4 grid steps (2 TCs x double-buffer
    #     on v7x; ~neutral on single-TC v5e/v6e).
    tm = min(tile_rows, rows)
    if rows >= 32:
        tm = min(tm, max(8, (rows // 4) // 8 * 8))
    tm = max(8, (tm // 8) * 8)
    grid = pl.cdiv(rows, tm)  # boundary row-block (rows % tm != 0) handled by Pallas

    out = pl.pallas_call(
        _linear_kernel,
        out_shape=jax.ShapeDtypeStruct((rows, lanes), x.dtype),
        grid=(grid,),
        in_specs=[
            pl.BlockSpec((tm, lanes), lambda i: (i, 0)),          # x tiles (VMEM)
            pl.BlockSpec(memory_space=pltpu.MemorySpace.SMEM),    # weight scalar
            pl.BlockSpec(memory_space=pltpu.MemorySpace.SMEM),    # bias scalar
        ],
        out_specs=pl.BlockSpec((tm, lanes), lambda i: (i, 0)),
        compiler_params=pltpu.CompilerParams(
            dimension_semantics=("parallel",),
        ),
        cost_estimate=pl.CostEstimate(
            flops=2 * rows * lanes,
            bytes_accessed=8 * rows * lanes,
            transcendentals=0,
        ),
    )(slab, weight, bias.reshape(1, 1))

    y_main = out.reshape(n_main, 1)
    if n_main == n:
        return y_main                       # exact multiple: no pad, no slice
    # < `lanes` leftover elements: tiny fused XLA op, one small stitch.
    y_tail = x[n_main:] * w + b
    return jnp.concatenate([y_main, y_tail], axis=0)


if __name__ == "__main__":
    key = jax.random.PRNGKey(0)
    kx, kw, kb, kx2, kx3 = jax.random.split(key, 5)

    # Deterministic parameters (shapes from torch.nn.Linear(1, 1)).
    weight = jax.random.uniform(kw, (1, 1), jnp.float32, -1.0, 1.0)
    bias = jax.random.uniform(kb, (1,), jnp.float32, -1.0, 1.0)

    # Small example input consistent with forward (batch=8, in_features=1):
    # exercises the small-N bypass path.
    x = jax.random.normal(kx, (8, 1), jnp.float32)
    y = jax.block_until_ready(linear_forward(x, weight, bias))
    y_ref = x @ weight.T + bias
    assert y.shape == (8, 1)
    assert jnp.allclose(y, y_ref, atol=1e-6), "mismatch vs reference (N=8)"

    # Exact-multiple batch: zero-copy reshape in/out, >= 4 parallel grid steps.
    x2 = jax.random.normal(kx2, (65536, 1), jnp.float32)
    y2 = jax.block_until_ready(linear_forward(x2, weight, bias))
    y2_ref = x2 @ weight.T + bias
    assert y2.shape == (65536, 1)
    assert jnp.allclose(y2, y2_ref, atol=1e-6), "mismatch vs reference (N=65536)"

    # Ragged batch: boundary row-block in the grid + tiny jnp tail stitch.
    x3 = jax.random.normal(kx3, (300000, 1), jnp.float32)
    y3 = jax.block_until_ready(linear_forward(x3, weight, bias))
    y3_ref = x3 @ weight.T + bias
    assert y3.shape == (300000, 1)
    assert jnp.allclose(y3, y3_ref, atol=1e-6), "mismatch vs reference (N=300000)"

    print("KERNEL_OK")
</pallas_src>

<mosaic_0001>
module attributes {stable_mosaic.version = 11 : i64} {
  func.func @_linear_kernel(%arg0: i32, %arg1: memref<16x1024xf32, #tpu.memory_space<vmem>>, %arg2: memref<1x1xf32, #tpu.memory_space<smem>>, %arg3: memref<1x1xf32, #tpu.memory_space<smem>>, %arg4: memref<16x1024xf32, #tpu.memory_space<vmem>>) attributes {dimension_semantics = [#tpu.dimension_semantics<parallel>], iteration_bounds = array<i64: 4>, scalar_prefetch = 0 : i64, scratch_operands = 0 : i64, tpu.core_type = #tpu.core_type<tc>, window_params = [{transform_indices = @transform_0, window_bounds = array<i64: 16, 1024>}, {transform_indices = @transform_1, window_bounds = array<i64: 1, 1>}, {transform_indices = @transform_2, window_bounds = array<i64: 1, 1>}, {transform_indices = @transform_3, window_bounds = array<i64: 16, 1024>}]} {
    %c0 = arith.constant 0 : index
    %c0_0 = arith.constant 0 : index
    %0 = memref.load %arg2[%c0, %c0_0] : memref<1x1xf32, #tpu.memory_space<smem>>
    %c0_1 = arith.constant 0 : index
    %c0_2 = arith.constant 0 : index
    %1 = memref.load %arg3[%c0_1, %c0_2] : memref<1x1xf32, #tpu.memory_space<smem>>
    %c0_3 = arith.constant 0 : index
    %c0_4 = arith.constant 0 : index
    %2 = vector.load %arg1[%c0_3, %c0_4] : memref<16x1024xf32, #tpu.memory_space<vmem>>, vector<16x1024xf32>
    %3 = vector.broadcast %0 : f32 to vector<16x1024xf32>
    %4 = arith.mulf %2, %3 : vector<16x1024xf32>
    %5 = vector.broadcast %1 : f32 to vector<16x1024xf32>
    %6 = arith.addf %4, %5 : vector<16x1024xf32>
    %c0_5 = arith.constant 0 : index
    %c0_6 = arith.constant 0 : index
    %7 = vector.load %arg4[%c0_5, %c0_6] : memref<16x1024xf32, #tpu.memory_space<vmem>>, vector<16x1024xf32>
    tpu.vector_store %arg4[%c0_5, %c0_6], %6 {strides = array<i32>} : memref<16x1024xf32, #tpu.memory_space<vmem>>, vector<16x1024xf32>,
    return
  }
  func.func @transform_0(%arg0: i32) -> (i32, i32) {
    %c0_i32 = arith.constant 0 : i32
    %c0_i32_0 = arith.constant 0 : i32
    return %arg0, %c0_i32 : i32, i32
  }
  func.func @transform_1(%arg0: i32) -> (i32, i32) {
    %c0_i32 = arith.constant 0 : i32
    %c0_i32_0 = arith.constant 0 : i32
    %c0_i32_1 = arith.constant 0 : i32
    return %c0_i32, %c0_i32_0 : i32, i32
  }
  func.func @transform_2(%arg0: i32) -> (i32, i32) {
    %c0_i32 = arith.constant 0 : i32
    %c0_i32_0 = arith.constant 0 : i32
    %c0_i32_1 = arith.constant 0 : i32
    return %c0_i32, %c0_i32_0 : i32, i32
  }
  func.func @transform_3(%arg0: i32) -> (i32, i32) {
    %c0_i32 = arith.constant 0 : i32
    %c0_i32_0 = arith.constant 0 : i32
    return %arg0, %c0_i32 : i32, i32
  }
}

</mosaic_0001>

<bundles_post_ra>
// kernel: tpu_custom_call.1
= control target key start
LH: loop header
LB: loop body
LE: loop exit
PB: predicated region body
PF: predicated region fallthrough
CT: control target
= control target key end

     0   :  { %s769_s0 = inlined_call_operand.hbm [shape: f32[64,1024], index: 0, kind: input, shape index: {}]   ;;  %s770_s1 = inlined_call_operand.<no memory space> [shape: f32[1,1], index: 1, kind: input, shape index: {}]   ;;  %s771_s2 = inlined_call_operand.<no memory space> [shape: f32[1,1], index: 2, kind: input, shape index: {}]   ;;  %s772_s3 = inlined_call_operand.hbm [shape: f32[64,1024], index: 3, kind: output, shape index: {}]  }
   0x1   :  { %8 = sst [smem:[#allocation2]] %s770_s1 }
   0x2   :  { %9 = sst [smem:[#allocation3]] %s771_s2 }
   0x3   :  { %10 = vsyncpa [#allocation5], 0 }
   0x4   :  { %12 = vsyncpa [#allocation5 + $0x1], 0 }
   0x5   :  { %13 = vsyncpa [#allocation6], 0 }
   0x6   :  { %15 = vsyncpa [#allocation6 + $0x1], 0  ;;  %s550_s16 = smov 0   ;;  %s552_s17 = smov 0  }
   0x7   :  { %s554_s18 = smov 0   ;;  %s556_s19 = smov 0  }
   0x8 LB: > { %s571_s1 = sadd.s32 4294967295, %s516_s19   ;;  %s350_s2 = sadd.s32 4294967294, %s516_s19   ;;  %s516_s19 = sphi %s556_s19, %s784_s19   ;;  %s512_s18 = sphi %s554_s18, %s783_s18   ;;  %s508_s17 = sphi %s552_s17, %s782_s17   ;;  %s504_s16 = sphi %s550_s16, %s781_s16  }
   0x9   : > { %s575_s20 = sadd.s32 1, %s516_s19   ;;  %s28_s21 = sadd.s32 1, %s512_s18 }
   0xa   : > { %s25_s22 = ssub.s32 %s516_s19, %s575_s20  ;;  %p35_p0 = scmp.ne.s32.totalorder %s512_s18, %s508_s17 }
   0xb   : > { %p26_p1 = scmp.eq.s32.totalorder %s25_s22, 0  ;;  %p36_p2 = scmp.eq.s32.totalorder %s516_s19, 0 }
   0xc   : > { %p41_p3 = scmp.ne.s32.totalorder %s508_s17, %s504_s16  ;;  %p42_p4 = scmp.eq.s32.totalorder %s571_s1, 0 }
   0xd   : > { %s587_s23 = scalar_select %p26_p1, %s512_s18, %s28_s21  }
   0xe   : > { %p589_p5 = por %p36_p2, %p35_p0  ;;  %p593_p6 = por %p42_p4, %p41_p3 }
   0xf   : > { %p107_p7 = scmp.eq.s32.totalorder %s571_s1, 3  ;;  %p113_p8 = scmp.eq.s32.totalorder %s350_s2, 3 }
  0x10   : > { %p382_p9 = scmp.lt.s32.totalorder %s516_s19, 4  ;;  %s139_s28 = sand.u32 1, %s512_s18  }
  0x11   : > { %p599_p10 = por %p107_p7, %p35_p0  ;;  %p603_p11 = por %p113_p8, %p41_p3 }
  0x12   : > { %s367_s29 = sshll.u32 %s516_s19, 11  ;;  %s353_s30 = sshll.u32 %s139_s28, 7 }
  0x13   : > { %s776_s26 = scalar_select %p599_p10, 1, 0 }
  0x14   : > { %s777_s27 = scalar_select %p603_p11, 1, 0 }
  0x15   : > { %s612_s6 = scalar_lea.hbm %s769_s0, %s367_s29  ;;  %s143_s7 = scalar_lea.vmem [#allocation4], %s353_s30 }
  0x16   : > { %s151_s8 = sshll.u32 %s143_s7, 4  ;;  %p616_p12 = pnand %p382_p9, %p589_p5  ;;  %s620_s8 = int_to_ptr.vmem [resolvable:$true] %s151_s8 }
  0x17   : > { %s622_s10 = scalar_lea.sflag [#allocation5], %s139_s28  ;;  %s420_s11 = scalar_lea.hbm %s612_s6, 2048 }
  0x18   : > { %p421_p13 = scmp.ne.s32.totalorder %s612_s6, %s420_s11  ;;  %p422_p0 = pneg %p616_p12 }
  0x19   : > { %s425_s14 = scalar_lea.hbm %s769_s0, 8192  ;;  %p426_p3 = scmp.lt.u32.totalorder %s612_s6, %s769_s0 }
  0x1a   : > { %p423_p1 = pnand %p422_p0, %p421_p13  ;;  %p427_p4 = scmp.lt.u32.totalorder %s425_s14, %s420_s11 }
  0x1b   : > { %p429_p7 = scmp.lt.u32.totalorder %s420_s11, %s612_s6 }
  0x1c   : > { %p424_p2 = pneg %p423_p1  ;;  %p428_p5 = por %p427_p4, %p426_p3 }
  0x1e   : > { %p430_p8 = por %p429_p7, %p428_p5 }
  0x20   : > { %p431_p9 = pnand %p430_p8, %p424_p2 }
  0x22   : > { %434 = shalt.err (!%p431_p9)
}
  0x23   : > { %s435_s21 = scalar_lea.vmem %s620_s8, 2048  ;;  %s518_s22 = smov [#allocation4]  }
  0x24   : > { %p436_p13 = scmp.ne.s32.totalorder %s620_s8, %s435_s21  ;;  %s440_s24 = sshll.u32 %s518_s22, 4  ;;  %s441_s24 = int_to_ptr.vmem [resolvable:$false] %s440_s24 }
  0x25   : > { %s442_s28 = scalar_lea.vmem %s441_s24, 4096  ;;  %p443_p10 = scmp.lt.s32.totalorder %s620_s8, %s441_s24 }
  0x26   : > { %p438_p1 = pnand %p436_p13, %p422_p0  ;;  %p444_p3 = scmp.lt.s32.totalorder %s442_s28, %s435_s21 }
  0x28   : > { %p439_p11 = pneg %p438_p1  ;;  %p445_p4 = por %p444_p3, %p443_p10 }
  0x2a   : > { %p446_p5 = pnand %p445_p4, %p439_p11 }
  0x2c   : > { %449 = shalt.err (!%p446_p5)
}
  0x2d   : > { %s519_s29 = smov 1024   ;;  %s520_s30 = smov 64  }
  0x2e   : > { %377 = dma.hbm_to_vmem [thread:$0]  (!%p616_p12), %s612_s6, 2048, %s620_s8, %s622_s10, %s519_s29, %s519_s29, %s520_s30  }
  0x2f   : > { %p357_p0 = scmp.ge.s32.totalorder %s516_s19, 1  ;;  %p159_p2 = scmp.lt.s32.totalorder %s516_s19, 5 }
  0x31   : > { %p160_p7 = pnand %p357_p0, %p159_p2 }
  0x32   : > { %s653_s4 = sand.u32 (!%p160_p7), 1, %s508_s17  }
  0x33   : > { %163 = sbr.rel (%p160_p7) target bundleno = 93 (0x5d), region = 32  ;;  %s358_s5 = sshll.u32 (!%p160_p7), %s653_s4, 7 }
  0x34   : > { %s166_s7 = scalar_lea.sflag (!%p160_p7), [#allocation5], %s653_s4  ;;  %s659_s11 = scalar_lea.vmem (!%p160_p7), [#allocation4], %s358_s5 }
  0x3a   : > { %495 = dma.done.wait (%p593_p6), %s166_s7, 2048  }
  0x3b   : > { %497 = vsyncadd (%p593_p6), %s166_s7, 4294965248  ;;  %s194_s6 = sld [smem:[#allocation2]]  ;;  %v196_v0 = vld [vmem:[%s659_s11] sm:$0xff]  ;;  %v197_v3 = vld [vmem:[%s659_s11 + $0x8] sm:$0xff]  ;;  %s688_s25 = scalar_lea.vmem [#allocation7], %s358_s5 }
  0x3c   : > { %s195_s8 = sld [smem:[#allocation3]]  ;;  %v198_v6 = vld [vmem:[%s659_s11 + $0x10] sm:$0xff]  ;;  %v199_v7 = vld [vmem:[%s659_s11 + $0x18] sm:$0xff]  ;;  %v200_v8 = vld [vmem:[%s659_s11 + $0x20] sm:$0xff]  ;;  %s369_s9 = sshll.u32 %s571_s1, 11 }
  0x3d   : > { %v201_v12 = vld [vmem:[%s659_s11 + $0x28] sm:$0xff]  ;;  %v202_v13 = vld [vmem:[%s659_s11 + $0x30] sm:$0xff]  ;;  %v203_v14 = vld [vmem:[%s659_s11 + $0x38] sm:$0xff]  ;;  %s277_s10 = sshll.u32 %s688_s25, 4  ;;  %s717_s13 = scalar_lea.hbm %s772_s3, %s369_s9  ;;  %s719_s10 = int_to_ptr.vmem [resolvable:$true] %s277_s10 }
  0x3e   : > { %v204_v19 = vld [vmem:[%s659_s11 + $0x40] sm:$0xff]  ;;  %v205_v20 = vld [vmem:[%s659_s11 + $0x48] sm:$0xff]  ;;  %v206_v21 = vld [vmem:[%s659_s11 + $0x50] sm:$0xff]  ;;  %s263_s14 = scalar_lea.sflag [#allocation6], %s653_s4  ;;  %s450_s15 = scalar_lea.vmem %s719_s10, 2048 }
  0x3f   : > { %v207_v26 = vld [vmem:[%s659_s11 + $0x58] sm:$0xff]  ;;  %v208_v27 = vld [vmem:[%s659_s11 + $0x60] sm:$0xff]  ;;  %v209_v28 = vld [vmem:[%s659_s11 + $0x68] sm:$0xff]  ;;  %p451_p6 = scmp.ne.s32.totalorder %s719_s10, %s450_s15  ;;  %p779_p10 = scmp.ne.s32.totalorder %s776_s26, 0 }
  0x40   : > { %v210_v33 = vld [vmem:[%s659_s11 + $0x70] sm:$0xff]  ;;  %v211_v34 = vld [vmem:[%s659_s11 + $0x78] sm:$0xff]  ;;  %s521_s2 = smov [#allocation7]  }
  0x41   : > { %v212_v1 = vstv %s194_s6  ;;  %p452_p11 = pnand %p451_p6, %p779_p10  ;;  %s454_s21 = sshll.u32 %s521_s2, 4  ;;  %s455_s21 = int_to_ptr.vmem [resolvable:$false] %s454_s21 }
  0x42   : > { %v666_v2 = vstv %s195_s8  ;;  %v213_v4 = vmul.f32 %v212_v1, %v196_v0  ;;  %v214_v5 = vmul.f32 %v212_v1, %v197_v3  ;;  %v215_v9 = vmul.f32 %v212_v1, %v198_v6  ;;  %s456_s22 = scalar_lea.vmem %s455_s21, 4096  ;;  %p457_p8 = scmp.lt.s32.totalorder %s719_s10, %s455_s21 }
  0x43   : > { %v216_v10 = vmul.f32 %v212_v1, %v199_v7  ;;  %v217_v11 = vmul.f32 %v212_v1, %v200_v8  ;;  %v218_v17 = vmul.f32 %v212_v1, %v201_v12  ;;  %v219_v18 = vmul.f32 %v212_v1, %v202_v13  ;;  %p453_p12 = pneg %p452_p11  ;;  %p458_p9 = scmp.lt.s32.totalorder %s456_s22, %s450_s15 }
  0x44   : > { %v230_v15 = vadd.f32 %v666_v2, %v213_v4  ;;  %v231_v16 = vadd.f32 %v666_v2, %v214_v5  ;;  %v232_v22 = vadd.f32 %v666_v2, %v215_v9  ;;  %v220_v25 = vmul.f32 %v212_v1, %v203_v14 }
  0x45   : > { %v233_v23 = vadd.f32 %v666_v2, %v216_v10  ;;  %v234_v24 = vadd.f32 %v666_v2, %v217_v11  ;;  %v235_v29 = vadd.f32 %v666_v2, %v218_v17  ;;  %v236_v30 = vadd.f32 %v666_v2, %v219_v18  ;;  %p459_p13 = por %p458_p9, %p457_p8 }
  0x46   : > { %246 = vst [vmem:[%s688_s25] sm:$0xff] %v230_v15  ;;  %247 = vst [vmem:[%s688_s25 + $0x8] sm:$0xff] %v231_v16  ;;  %v221_v31 = vmul.f32 %v212_v1, %v204_v19  ;;  %v222_v32 = vmul.f32 %v212_v1, %v205_v20  ;;  %v237_v35 = vadd.f32 %v666_v2, %v220_v25 }
  0x47   : > { %248 = vst [vmem:[%s688_s25 + $0x10] sm:$0xff] %v232_v22  ;;  %249 = vst [vmem:[%s688_s25 + $0x18] sm:$0xff] %v233_v23  ;;  %v223_v36 = vmul.f32 %v212_v1, %v206_v21  ;;  %v224_v37 = vmul.f32 %v212_v1, %v207_v26  ;;  %v225_v38 = vmul.f32 %v212_v1, %v208_v27  ;;  %p460_p1 = pnand %p459_p13, %p453_p12 }
  0x48   : > { %250 = vst [vmem:[%s688_s25 + $0x20] sm:$0xff] %v234_v24  ;;  %251 = vst [vmem:[%s688_s25 + $0x28] sm:$0xff] %v235_v29  ;;  %v238_v39 = vadd.f32 %v666_v2, %v221_v31  ;;  %v239_v40 = vadd.f32 %v666_v2, %v222_v32  ;;  %v226_v41 = vmul.f32 %v212_v1, %v209_v28 }
  0x49   : > { %252 = vst [vmem:[%s688_s25 + $0x30] sm:$0xff] %v236_v30  ;;  %v227_v42 = vmul.f32 %v212_v1, %v210_v33  ;;  %253 = vst [vmem:[%s688_s25 + $0x38] sm:$0xff] %v237_v35  ;;  %v240_v43 = vadd.f32 %v666_v2, %v223_v36  ;;  %v241_v44 = vadd.f32 %v666_v2, %v224_v37 }
  0x4a   : > { %v242_v45 = vadd.f32 %v666_v2, %v225_v38  ;;  %v228_v46 = vmul.f32 %v212_v1, %v211_v34  ;;  %254 = vst [vmem:[%s688_s25 + $0x40] sm:$0xff] %v238_v39  ;;  %255 = vst [vmem:[%s688_s25 + $0x48] sm:$0xff] %v239_v40  ;;  %v243_v47 = vadd.f32 %v666_v2, %v226_v41 }
  0x4b   : > { %v244_v48 = vadd.f32 %v666_v2, %v227_v42  ;;  %256 = vst [vmem:[%s688_s25 + $0x50] sm:$0xff] %v240_v43  ;;  %257 = vst [vmem:[%s688_s25 + $0x58] sm:$0xff] %v241_v44 }
  0x4c   : > { %258 = vst [vmem:[%s688_s25 + $0x60] sm:$0xff] %v242_v45  ;;  %v245_v49 = vadd.f32 %v666_v2, %v228_v46  ;;  %259 = vst [vmem:[%s688_s25 + $0x68] sm:$0xff] %v243_v47 }
  0x4d   : > { %260 = vst [vmem:[%s688_s25 + $0x70] sm:$0xff] %v244_v48 }
  0x4e   : > { %261 = vst [vmem:[%s688_s25 + $0x78] sm:$0xff] %v245_v49 }
  0x4f   : > { %463 = shalt.err (!%p460_p1)
}
  0x50   : > { %s464_s24 = scalar_lea.hbm %s717_s13, 2048  ;;  %s468_s30 = scalar_lea.hbm %s772_s3, 8192 }
  0x51   : > { %p465_p3 = scmp.ne.s32.totalorder %s717_s13, %s464_s24  ;;  %p469_p0 = scmp.lt.u32.totalorder %s717_s13, %s772_s3 }
  0x52   : > { %p470_p2 = scmp.lt.u32.totalorder %s468_s30, %s464_s24  ;;  %p472_p6 = scmp.lt.u32.totalorder %s464_s24, %s717_s13 }
  0x53   : > { %p466_p4 = pnand %p465_p3, %p779_p10 }
  0x54   : > { %p471_p7 = por %p470_p2, %p469_p0 }
  0x55   : > { %p467_p5 = pneg %p466_p4 }
  0x56   : > { %p473_p11 = por %p472_p6, %p471_p7 }
  0x58   : > { %p474_p12 = pnand %p473_p11, %p467_p5 }
  0x5a   : > { %477 = shalt.err (!%p474_p12)
}
  0x5b   : > { %s522_s11 = smov 1024   ;;  %s523_s6 = smov 64  }
  0x5c   : > { %372 = dma.vmem_to_hbm [thread:$0]  (%p779_p10), %s719_s10, 2048, %s717_s13, %s263_s14, %s522_s11, %s522_s11, %s523_s6  }
  0x5d PF: > { %p383_p8 = scmp.ge.s32.totalorder %s516_s19, 2  ;;  %s292_s8 = sand.u32 1, %s504_s16  }
  0x5e   : > { %p780_p9 = scmp.ne.s32.totalorder %s777_s27, 0  ;;  %s293_s25 = scalar_lea.sflag [#allocation6], %s292_s8 }
  0x60   : > { %p379_p13 = pnand %p383_p8, %p780_p9 }
  0x62   : > { %499 = dma.done.wait (!%p379_p13), %s293_s25, 2048  }
  0x63   : > { %501 = vsyncadd (!%p379_p13), %s293_s25, 4294965248  ;;  %p18_p1 = scmp.ge.s32.totalorder %s575_s20, 6   ;;  %s781_s16 = smov %s508_s17 }
  0x64   : > { %s782_s17 = smov %s512_s18  ;;  %s783_s18 = smov %s587_s23 }
  0x65   : > { %s784_s19 = smov %s575_s20  ;;  %20 = sbr.rel (!%p18_p1) target bundleno = 8 (0x8), region = 77 }
  0x6c   :  { %298 = vsyncpa [#allocation5], 1 }
  0x6d   :  { %300 = vsyncpa [#allocation5 + $0x1], 1 }
  0x6e   :  { %301 = vsyncpa [#allocation6], 1 }
  0x6f   :  { %303 = vsyncpa [#allocation6 + $0x1], 1 }

</bundles_post_ra>
